<compile_context>
chip_gen: v6e
topology: v6e:2x2x1
jax: 0.10.0
libtpu: 0.0.40
codegen_flags: <defaults>
</compile_context>

<pallas_src>
import jax
import jax.numpy as jnp
from jax.experimental import pallas as pl
from jax.experimental.pallas import tpu as pltpu


def _identity_copy_kernel(x_ref, o_ref):
    # forward() returns the parameter unchanged.
    o_ref[...] = x_ref[...]


def _lane_dense_shape(n):
    """Pick a 2-D view for n flat elements that fills lanes/sublanes when possible."""
    if n % 128 == 0:
        return (n // 128, 128)   # lane-dense -> unmasked full-width stores
    if n % 8 == 0:
        return (8, n // 8)       # sublane-dense fallback
    return (1, n)


def _pallas_identity(x):
    """Identity through a minimal Pallas kernel: no grid, whole-array VMEM specs,
    output aliased onto the input buffer."""
    flat_shape = _lane_dense_shape(x.size)
    x2d = x.reshape(flat_shape)
    out2d = pl.pallas_call(
        _identity_copy_kernel,
        out_shape=jax.ShapeDtypeStruct(flat_shape, x.dtype),
        in_specs=[pl.BlockSpec(memory_space=pltpu.MemorySpace.VMEM)],
        out_specs=pl.BlockSpec(memory_space=pltpu.MemorySpace.VMEM),
        input_output_aliases={0: 0},   # no re-materialized output buffer
    )(x2d)
    return out2d.reshape(x.shape)


def init_channel_style_delta_params(conv_dimension, dtype=jnp.float32):
    """Head init: nn.Parameter(torch.zeros(1, 1, c_in, 1, 1))."""
    c_in, _c_out = conv_dimension
    return {'shift': jnp.zeros((1, 1, c_in, 1, 1), dtype=dtype)}


def init_base_parametrization_params(conv_dimensions, dtype=jnp.float32):
    """BaseParametrization.__init__: one shift head per conv layer."""
    return {f'conv_{idx}': init_channel_style_delta_params(cd, dtype)
            for idx, cd in enumerate(conv_dimensions)}


def channel_style_delta_forward(shift_param, *, materialize_with_pallas=False):
    """Head forward: returns {'shift': shift}.

    By default (per perf review) this is a zero-cost identity -- the parameter
    is returned as-is, letting XLA alias the buffer.  Set
    materialize_with_pallas=True to route it through the optimized identity
    kernel when an explicit kernel boundary is required.
    """
    if not materialize_with_pallas:
        return {'shift': shift_param}
    return {'shift': _pallas_identity(shift_param)}


def base_parametrization_forward(params, *, materialize_with_pallas=False):
    """BaseParametrization.forward(): {key: head() for key, head in heads}."""
    return {
        key: channel_style_delta_forward(
            head['shift'], materialize_with_pallas=materialize_with_pallas)
        for key, head in params.items()
    }


# TODO(synk): freeze_layers / unfreeze_layers / get_training_layers / get_all_layers
# are host-side training bookkeeping (requires_grad toggles, key lists) with no
# device compute and therefore no Pallas equivalent.


if __name__ == "__main__":
    # Small deterministic setup consistent with the module: 3 conv heads,
    # each with (c_in, c_out).
    conv_dimensions = [(4, 8), (8, 16), (16, 32)]
    params = init_base_parametrization_params(conv_dimensions)

    # The real module initializes `shift` to zeros; also build a non-trivial
    # parameter set from PRNGKey(0) so the copy-through kernel is verifiable.
    key = jax.random.PRNGKey(0)
    keys = jax.random.split(key, len(conv_dimensions))
    rand_params = {
        k: {'shift': jax.random.normal(keys[i], v['shift'].shape,
                                       dtype=v['shift'].dtype)}
        for i, (k, v) in enumerate(params.items())
    }

    # Exercise the explicit Pallas path once.
    out_zero = base_parametrization_forward(params, materialize_with_pallas=True)
    out_rand = base_parametrization_forward(rand_params, materialize_with_pallas=True)
    jax.block_until_ready((out_zero, out_rand))

    for k, (c_in, _c_out) in zip(params.keys(), conv_dimensions):
        assert out_zero[k]['shift'].shape == (1, 1, c_in, 1, 1)
        assert out_zero[k]['shift'].dtype == params[k]['shift'].dtype
        assert jnp.array_equal(out_zero[k]['shift'], params[k]['shift'])
        assert jnp.array_equal(out_rand[k]['shift'], rand_params[k]['shift'])

    # Default (kernel-free) fast path must match as well.
    out_fast = base_parametrization_forward(rand_params)
    for k in params:
        assert jnp.array_equal(out_fast[k]['shift'], rand_params[k]['shift'])

    print("KERNEL_OK")
</pallas_src>

<mosaic_0001>
module attributes {stable_mosaic.version = 11 : i64} {
  func.func @_identity_copy_kernel(%arg0: memref<1x4xf32, #tpu.memory_space<vmem>>, %arg1: memref<1x4xf32, #tpu.memory_space<vmem>>) attributes {dimension_semantics = [], scalar_prefetch = 0 : i64, scratch_operands = 0 : i64, tpu.core_type = #tpu.core_type<tc>} {
    %c0 = arith.constant 0 : index
    %c0_0 = arith.constant 0 : index
    %0 = vector.load %arg0[%c0, %c0_0] : memref<1x4xf32, #tpu.memory_space<vmem>>, vector<1x4xf32>
    %c0_1 = arith.constant 0 : index
    %c0_2 = arith.constant 0 : index
    %1 = vector.load %arg1[%c0_1, %c0_2] : memref<1x4xf32, #tpu.memory_space<vmem>>, vector<1x4xf32>
    tpu.vector_store %arg1[%c0_1, %c0_2], %0 {strides = array<i32>} : memref<1x4xf32, #tpu.memory_space<vmem>>, vector<1x4xf32>,
    return
  }
}

</mosaic_0001>

<bundles_post_ra>
// kernel: tpu_custom_call.1
= control target key start
LH: loop header
LB: loop body
LE: loop exit
PB: predicated region body
PF: predicated region fallthrough
CT: control target
= control target key end

     0   :  { %6 = vsyncpa [#allocation3], 0  ;;  %s103_s0 = inlined_call_operand.hbm [shape: f32[1,4], index: 0, kind: input, shape index: {}, may-alias: {0,1}]   ;;  %s104_s1 = inlined_call_operand.hbm [shape: f32[1,4], index: 1, kind: output, shape index: {}, may-alias: {0,1}]  }
   0x1   :  { %7 = vsyncpa [#allocation4], 0  ;;  %s85_s6 = smov [#allocation2]  }
   0x2   :  { %s14_s7 = sshll.u32 %s85_s6, 4  ;;  %s15_s7 = int_to_ptr.vmem [resolvable:$true] %s14_s7 }
   0x3   :  { %s49_s8 = scalar_lea.vmem %s15_s7, 16  ;;  %s53_s9 = scalar_lea.vmem %s15_s7, 32 }
   0x4   :  { %p50_p0 = scmp.ne.s32.totalorder %s15_s7, %s49_s8  ;;  %p54_p1 = scmp.lt.s32.totalorder %s15_s7, %s15_s7 }
   0x5   :  { %p55_p2 = scmp.lt.s32.totalorder %s53_s9, %s49_s8 }
   0x7   :  { %p56_p3 = por %p55_p2, %p54_p1 }
   0x9   :  { %p57_p4 = pnand %p56_p3, %p50_p0 }
   0xb   :  { %60 = shalt.err (!%p57_p4)
}
   0xc   :  { %17 = dma.hbm_to_vmem [thread:$0]  %s103_s0, 16, %s15_s7, [#allocation3]  }
   0xd   :  { %81 = dma.done.wait [#allocation3], 16  }
   0xe   :  { %82 = vsyncadd [#allocation3], 4294967280  ;;  %s86_s12 = smov [#allocation5]   ;;  %vm22_vm0 = vcmask 24576   ;;  %v21_v0 = vld [vmem:[#allocation2] sm:$0x1] }
   0xf   :  { %s30_s13 = sshll.u32 %s86_s12, 4  ;;  %23 = vst.msk [vmem:[#allocation5] sm:$0x1] %vm22_vm0, %v21_v0  ;;  %s31_s13 = int_to_ptr.vmem [resolvable:$true] %s30_s13 }
  0x10   :  { %s61_s14 = scalar_lea.vmem %s31_s13, 16  ;;  %s65_s15 = scalar_lea.vmem %s31_s13, 32 }
  0x11   :  { %p62_p5 = scmp.ne.s32.totalorder %s31_s13, %s61_s14  ;;  %p66_p6 = scmp.lt.s32.totalorder %s31_s13, %s31_s13 }
  0x12   :  { %p67_p7 = scmp.lt.s32.totalorder %s65_s15, %s61_s14 }
  0x14   :  { %p68_p8 = por %p67_p7, %p66_p6 }
  0x16   :  { %p69_p9 = pnand %p68_p8, %p62_p5 }
  0x18   :  { %72 = shalt.err (!%p69_p9)
}
  0x19   :  { %33 = dma.vmem_to_hbm [thread:$0]  %s31_s13, 16, %s104_s1, [#allocation4]  }
  0x1a   :  { %83 = dma.done.wait [#allocation4], 16  }
  0x1b   :  { %84 = vsyncadd [#allocation4], 4294967280 }
  0x1c   :  { %37 = vsyncpa [#allocation3], 1 }
  0x1d   :  { %38 = vsyncpa [#allocation4], 1 }

</bundles_post_ra>
